<compile_context>
chip_gen: v7x
topology: tpu7x:2x2x1
jax: 0.10.0
libtpu: 0.0.40
codegen_flags: <defaults>
</compile_context>

<pallas_src>
import jax
import jax.numpy as jnp
from jax.experimental import pallas as pl
from jax.experimental.pallas import tpu as pltpu


# --------------------------------------------------------------------------- #
# Kernel
# --------------------------------------------------------------------------- #
def actnorm_kernel(x_ref, w_ref, b_ref, y_ref):
    """One batch tile of y = x * exp(weight) + bias.

    x_ref : (BB, F)   input tile
    w_ref : (1,  F)   log-scale (weight)
    b_ref : (1,  F)   bias
    y_ref : (BB, F)   output tile
    """
    scale = jnp.exp(w_ref[...])                       # (1, F) f32, EUP slot
    x = x_ref[...].astype(jnp.float32)
    y_ref[...] = (x * scale + b_ref[...]).astype(y_ref.dtype)


# --------------------------------------------------------------------------- #
# Wrapper
# --------------------------------------------------------------------------- #
def _choose_batch_block(batch, requested=512):
    """Large, 8-aligned batch tile; prefer >=2 grid steps (v7x megacore)."""
    if batch <= 8:
        return batch
    bb = min(requested, batch)
    bb = max(8, (bb // 8) * 8)
    if bb >= batch:                       # would be a single grid step
        half = (batch + 1) // 2
        bb = max(8, ((half + 7) // 8) * 8)
    return bb


def actnorm1d_forward(x, weight, bias, *, batch_block=512):
    """Returns (x * exp(weight) + bias, sum(weight)) — ActNorm1D.forward."""
    B, F = x.shape
    w2 = weight.reshape(1, F).astype(jnp.float32)
    b2 = bias.reshape(1, F).astype(jnp.float32)

    bb = _choose_batch_block(B, batch_block)
    grid = (pl.cdiv(B, bb),)

    itemsize = jnp.dtype(x.dtype).itemsize
    tile_bytes = bb * F * itemsize
    # x + y, double-buffered, plus slack; clamp to a safe range on all chips
    # (v7x has only 64 MiB physical VMEM).
    vmem_limit = int(min(max(6 * tile_bytes + (1 << 20), 16 << 20), 48 << 20))

    cost = pl.CostEstimate(
        flops=2 * B * F,                       # mul + add per element
        transcendentals=F,                     # exp(weight)
        bytes_accessed=2 * B * F * itemsize + 2 * F * 4,
    )

    y = pl.pallas_call(
        actnorm_kernel,
        out_shape=jax.ShapeDtypeStruct((B, F), x.dtype),
        grid=grid,
        in_specs=[
            pl.BlockSpec((bb, F), lambda i: (i, 0)),   # x tile
            pl.BlockSpec((1, F), lambda i: (0, 0)),    # weight (resident)
            pl.BlockSpec((1, F), lambda i: (0, 0)),    # bias   (resident)
        ],
        out_specs=pl.BlockSpec((bb, F), lambda i: (i, 0)),
        compiler_params=pltpu.CompilerParams(
            dimension_semantics=("parallel",),
            vmem_limit_bytes=vmem_limit,
        ),
        cost_estimate=cost,
    )(x, w2, b2)

    logdet = jnp.sum(weight)                    # scalar, matches torch.sum(weight)
    return y, logdet


def actnorm1d_init(x):
    """Data-dependent init (PyTorch is_init == 0 path): unbiased std, as torch.var."""
    mean = jnp.mean(x, axis=0)
    std = jnp.sqrt(jnp.var(x, axis=0, ddof=1))
    weight = -jnp.log(std)
    bias = -mean / std
    return weight, bias


def reference_forward(x, weight, bias):
    scale = jnp.exp(weight)
    return x * scale[None, :] + bias[None, :], jnp.sum(weight)


# --------------------------------------------------------------------------- #
# Self-test
# --------------------------------------------------------------------------- #
if __name__ == "__main__":
    B, FEATURES = 64, 256                     # small; FEATURES is a lane multiple

    key = jax.random.PRNGKey(0)
    kx, kw, kb = jax.random.split(key, 3)
    x = jax.random.normal(kx, (B, FEATURES), jnp.float32) * 2.3 + 0.7

    # --- First call: data-dependent init (mirrors the is_init==0 branch). ---
    weight, bias = actnorm1d_init(x)
    y, logdet = actnorm1d_forward(x, weight, bias)
    y = jax.block_until_ready(y)

    y_ref, logdet_ref = reference_forward(x, weight, bias)
    assert y.shape == (B, FEATURES)
    assert jnp.allclose(y, y_ref, atol=1e-5, rtol=1e-5), "mismatch vs reference (init path)"
    assert jnp.allclose(logdet, logdet_ref, atol=1e-5, rtol=1e-5)

    # --- Second call: already-initialized (generic affine) path. ---
    weight2 = 0.1 * jax.random.normal(kw, (FEATURES,), jnp.float32)
    bias2 = jax.random.normal(kb, (FEATURES,), jnp.float32)
    y2, logdet2 = actnorm1d_forward(x, weight2, bias2)
    y2 = jax.block_until_ready(y2)

    y2_ref, logdet2_ref = reference_forward(x, weight2, bias2)
    assert jnp.allclose(y2, y2_ref, atol=1e-5, rtol=1e-5), "mismatch vs reference"
    assert jnp.allclose(logdet2, logdet2_ref, atol=1e-6, rtol=1e-6)

    print("KERNEL_OK")
</pallas_src>

<mosaic_0001>
module attributes {stable_mosaic.version = 11 : i64} {
  func.func @actnorm_kernel(%arg0: i32, %arg1: memref<32x256xf32, #tpu.memory_space<vmem>>, %arg2: memref<1x256xf32, #tpu.memory_space<vmem>>, %arg3: memref<1x256xf32, #tpu.memory_space<vmem>>, %arg4: memref<32x256xf32, #tpu.memory_space<vmem>>) attributes {dimension_semantics = [#tpu.dimension_semantics<parallel>], iteration_bounds = array<i64: 2>, scalar_prefetch = 0 : i64, scratch_operands = 0 : i64, tpu.core_type = #tpu.core_type<tc>, window_params = [{transform_indices = @transform_0, window_bounds = array<i64: 32, 256>}, {pipeline_mode = #tpu.pipeline_mode<synchronous>, transform_indices = @transform_1, window_bounds = array<i64: 1, 256>}, {pipeline_mode = #tpu.pipeline_mode<synchronous>, transform_indices = @transform_2, window_bounds = array<i64: 1, 256>}, {transform_indices = @transform_3, window_bounds = array<i64: 32, 256>}]} {
    %c0 = arith.constant 0 : index
    %c0_0 = arith.constant 0 : index
    %0 = vector.load %arg2[%c0, %c0_0] : memref<1x256xf32, #tpu.memory_space<vmem>>, vector<1x256xf32>
    %1 = math.exp %0 : vector<1x256xf32>
    %c0_1 = arith.constant 0 : index
    %c0_2 = arith.constant 0 : index
    %2 = vector.load %arg1[%c0_1, %c0_2] : memref<32x256xf32, #tpu.memory_space<vmem>>, vector<32x256xf32>
    %3 = vector.broadcast %1 : vector<1x256xf32> to vector<32x256xf32>
    %4 = arith.mulf %2, %3 : vector<32x256xf32>
    %c0_3 = arith.constant 0 : index
    %c0_4 = arith.constant 0 : index
    %5 = vector.load %arg3[%c0_3, %c0_4] : memref<1x256xf32, #tpu.memory_space<vmem>>, vector<1x256xf32>
    %6 = vector.broadcast %5 : vector<1x256xf32> to vector<32x256xf32>
    %7 = arith.addf %4, %6 : vector<32x256xf32>
    %c0_5 = arith.constant 0 : index
    %c0_6 = arith.constant 0 : index
    %8 = vector.load %arg4[%c0_5, %c0_6] : memref<32x256xf32, #tpu.memory_space<vmem>>, vector<32x256xf32>
    tpu.vector_store %arg4[%c0_5, %c0_6], %7 {strides = array<i32>} : memref<32x256xf32, #tpu.memory_space<vmem>>, vector<32x256xf32>,
    return
  }
  func.func @transform_0(%arg0: i32) -> (i32, i32) {
    %c0_i32 = arith.constant 0 : i32
    %c0_i32_0 = arith.constant 0 : i32
    return %arg0, %c0_i32 : i32, i32
  }
  func.func @transform_1(%arg0: i32) -> (i32, i32) {
    %c0_i32 = arith.constant 0 : i32
    %c0_i32_0 = arith.constant 0 : i32
    %c0_i32_1 = arith.constant 0 : i32
    return %c0_i32, %c0_i32_0 : i32, i32
  }
  func.func @transform_2(%arg0: i32) -> (i32, i32) {
    %c0_i32 = arith.constant 0 : i32
    %c0_i32_0 = arith.constant 0 : i32
    %c0_i32_1 = arith.constant 0 : i32
    return %c0_i32, %c0_i32_0 : i32, i32
  }
  func.func @transform_3(%arg0: i32) -> (i32, i32) {
    %c0_i32 = arith.constant 0 : i32
    %c0_i32_0 = arith.constant 0 : i32
    return %arg0, %c0_i32 : i32, i32
  }
}

</mosaic_0001>

<bundles_post_ra>
// kernel: tpu_custom_call.1
= control target key start
LH: loop header
LB: loop body
LE: loop exit
PB: predicated region body
PF: predicated region fallthrough
CT: control target
= control target key end

     0   :  { %8 = vsyncpa [#allocation3], 0  ;;  %s702_s0 = inlined_call_operand.hbm [shape: f32[64,256], index: 0, kind: input, shape index: {}]   ;;  %s703_s1 = inlined_call_operand.vmem [shape: f32[1,256], index: 1, kind: input, shape index: {}]   ;;  %s704_s2 = inlined_call_operand.vmem [shape: f32[1,256], index: 2, kind: input, shape index: {}]   ;;  %s705_s3 = inlined_call_operand.hbm [shape: f32[64,256], index: 3, kind: output, shape index: {}]  }
   0x1   :  { %10 = vsyncpa [#allocation3 + $0x1], 0 }
   0x2   :  { %11 = vsyncpa [#allocation4], 0 }
   0x3   :  { %13 = vsyncpa [#allocation4 + $0x1], 0  ;;  %s534_s12 = smov 0   ;;  %s536_s13 = smov 0  }
   0x4   :  { %s538_s14 = smov 0   ;;  %s540_s15 = smov 0  }
   0x5 LB: > { %s555_s16 = sadd.s32 4294967295, %s506_s15   ;;  %s338_s17 = sadd.s32 4294967294, %s506_s15   ;;  %s506_s15 = sphi %s540_s15, %s718_s15   ;;  %s502_s14 = sphi %s538_s14, %s717_s14   ;;  %s498_s13 = sphi %s536_s13, %s716_s13   ;;  %s494_s12 = sphi %s534_s12, %s715_s12  }
   0x6   : > { %s559_s18 = sadd.s32 1, %s506_s15   ;;  %s26_s19 = sadd.s32 1, %s502_s14 }
   0x7   : > { %s23_s20 = ssub.s32 %s506_s15, %s559_s18  ;;  %p33_p0 = scmp.ne.s32.totalorder %s502_s14, %s498_s13 }
   0x8   : > { %p24_p1 = scmp.eq.s32.totalorder %s23_s20, 0  ;;  %p34_p2 = scmp.eq.s32.totalorder %s506_s15, 0 }
   0x9   : > { %p39_p3 = scmp.ne.s32.totalorder %s498_s13, %s494_s12  ;;  %p40_p4 = scmp.eq.s32.totalorder %s555_s16, 0 }
   0xa   : > { %s571_s21 = scalar_select %p24_p1, %s502_s14, %s26_s19  }
   0xb   : > { %p573_p5 = por %p34_p2, %p33_p0  ;;  %p577_p6 = por %p40_p4, %p39_p3 }
   0xc   : > { %p105_p7 = scmp.eq.s32.totalorder %s555_s16, 1  ;;  %p111_p8 = scmp.eq.s32.totalorder %s338_s17, 1 }
   0xd   : > { %p370_p10 = scmp.lt.s32.totalorder %s506_s15, 2  ;;  %s137_s26 = sand.u32 1, %s502_s14  }
   0xe   : > { %p584_p11 = por %p105_p7, %p33_p0  ;;  %p588_p12 = por %p111_p8, %p39_p3 }
   0xf   : > { %s355_s27 = sshll.u32 %s506_s15, 10  ;;  %s341_s28 = sshll.u32 %s137_s26, 6 }
  0x10   : > { %s709_s24 = scalar_select %p584_p11, 1, 0 }
  0x11   : > { %s710_s25 = scalar_select %p588_p12, 1, 0 }
  0x12   : > { %s597_s4 = scalar_lea.hbm %s702_s0, %s355_s27  ;;  %s141_s5 = scalar_lea.vmem [#allocation2], %s341_s28 }
  0x13   : > { %s149_s6 = sshll.u32 %s141_s5, 4  ;;  %p601_p13 = pnand %p370_p10, %p573_p5  ;;  %s605_s6 = int_to_ptr.vmem [resolvable:$true] %s149_s6 }
  0x14   : > { %s607_s8 = scalar_lea.sflag [#allocation3], %s137_s26  ;;  %s410_s9 = scalar_lea.hbm %s597_s4, 1024 }
  0x15   : > { %p411_p0 = scmp.ne.s32.totalorder %s597_s4, %s410_s9  ;;  %p412_p1 = pneg %p601_p13 }
  0x16   : > { %s415_s17 = scalar_lea.hbm %s702_s0, 2048  ;;  %p416_p4 = scmp.lt.u32.totalorder %s597_s4, %s702_s0 }
  0x17   : > { %p413_p2 = pnand %p412_p1, %p411_p0  ;;  %p417_p5 = scmp.lt.u32.totalorder %s415_s17, %s410_s9 }
  0x18   : > { %p419_p8 = scmp.lt.u32.totalorder %s410_s9, %s597_s4 }
  0x19   : > { %p414_p3 = pneg %p413_p2  ;;  %p418_p7 = por %p417_p5, %p416_p4 }
  0x1b   : > { %p420_p10 = por %p419_p8, %p418_p7 }
  0x1d   : > { %p421_p9 = pnand %p420_p10, %p414_p3 }
  0x1f   : > { %424 = shalt.err (!%p421_p9)
}
  0x20   : > { %s425_s22 = scalar_lea.vmem %s605_s6, 1024  ;;  %s508_s26 = smov [#allocation2]  }
  0x21   : > { %p426_p0 = scmp.ne.s32.totalorder %s605_s6, %s425_s22  ;;  %s430_s27 = sshll.u32 %s508_s26, 4  ;;  %s431_s27 = int_to_ptr.vmem [resolvable:$false] %s430_s27 }
  0x22   : > { %s432_s28 = scalar_lea.vmem %s431_s27, 2048  ;;  %p433_p11 = scmp.lt.s32.totalorder %s605_s6, %s431_s27 }
  0x23   : > { %p428_p2 = pnand %p426_p0, %p412_p1  ;;  %p434_p4 = scmp.lt.s32.totalorder %s432_s28, %s425_s22 }
  0x25   : > { %p429_p12 = pneg %p428_p2  ;;  %p435_p5 = por %p434_p4, %p433_p11 }
  0x27   : > { %p436_p7 = pnand %p435_p5, %p429_p12 }
  0x29   : > { %439 = shalt.err (!%p436_p7)
}
  0x2a   : > { %s509_s29 = smov 256   ;;  %s510_s30 = smov 16  }
  0x2b   : > { %365 = dma.hbm_to_vmem [thread:$0]  (!%p601_p13), %s597_s4, 1024, %s605_s6, %s607_s8, %s509_s29, %s509_s29, %s510_s30  }
  0x2c   : > { %p345_p9 = scmp.ge.s32.totalorder %s506_s15, 1  ;;  %p157_p1 = scmp.lt.s32.totalorder %s506_s15, 3 }
  0x2e   : > { %p158_p3 = pnand %p345_p9, %p157_p1 }
  0x2f   : > { %s638_s5 = sand.u32 (!%p158_p3), 1, %s498_s13  }
  0x30   : > { %161 = sbr.rel (%p158_p3) target bundleno = 94 (0x5e), region = 32  ;;  %s346_s9 = sshll.u32 (!%p158_p3), %s638_s5, 6 }
  0x31   : > { %s164_s10 = scalar_lea.sflag (!%p158_p3), [#allocation3], %s638_s5  ;;  %s167_s11 = scalar_lea.vmem (!%p158_p3), [#allocation2], %s346_s9 }
  0x37   : > { %485 = dma.done.wait (%p577_p6), %s164_s10, 1024  }
  0x38   : > { %487 = vsyncadd (%p577_p6), %s164_s10, 4294966272  ;;  %v192_v0 = vld [vmem:[%s703_s1] sm:$0x3]  ;;  %v204_v2 = vlaneseq  ;;  %v196_v8 = vld [vmem:[%s167_s11 + $0x8] sm:$0xff]  ;;  %s189_s23 = scalar_lea.vmem [#allocation5], %s346_s9  ;;  %s357_s19 = sshll.u32 %s555_s16, 10 }
  0x39   : > { %v193_v1 = vmul.f32 1.442695, %v192_v0  ;;  %v222_v6 = vld [vmem:[%s704_s2] sm:$0x3]  ;;  %v197_v10 = vld [vmem:[%s167_s11 + $0x10] sm:$0xff]  ;;  %v198_v11 = vld [vmem:[%s167_s11 + $0x18] sm:$0xff]  ;;  %s658_s16 = scalar_lea.hbm %s705_s3, %s357_s19 }
  0x3a   : > { %v205_v3 = vshrl.u32 %v204_v2, 7  ;;  %v195_v7 = vld [vmem:[%s167_s11] sm:$0xff]  ;;  %v200_v17 = vld [vmem:[%s167_s11 + $0x28] sm:$0xff]  ;;  %v201_v18 = vld [vmem:[%s167_s11 + $0x30] sm:$0xff]  ;;  %s265_s17 = sshll.u32 %s189_s23, 4  ;;  %s251_s26 = scalar_lea.sflag [#allocation4], %s638_s5  ;;  %s653_s17 = int_to_ptr.vmem [resolvable:$true] %s265_s17 }
  0x3b   : > { %408 = vpow2.f32 %v193_v1  ;;  %v199_v12 = vld [vmem:[%s167_s11 + $0x20] sm:$0xff]  ;;  %v202_v19 = vld [vmem:[%s167_s11 + $0x38] sm:$0xff]  ;;  %s440_s27 = scalar_lea.vmem %s653_s17, 1024  ;;  %p712_p11 = scmp.ne.s32.totalorder %s709_s24, 0 }
  0x3c   : > { %v206_v4 = vsub.s32 0, %v205_v3  ;;  %v210_v5 = vsub.s32 1, %v205_v3  ;;  %p441_p6 = scmp.ne.s32.totalorder %s653_s17, %s440_s27  ;;  %s511_s28 = smov [#allocation5]  }
  0x3d   : > { %s444_s29 = sshll.u32 %s511_s28, 4  ;;  %s445_s29 = int_to_ptr.vmem [resolvable:$false] %s444_s29 }
  0x3e   : > { %v227_v14 = vrot.slane %v222_v6, %v206_v4  ;;  %v231_v16 = vrot.slane %v222_v6, %v210_v5  ;;  %p442_p12 = pnand %p441_p6, %p712_p11  ;;  %s446_s30 = scalar_lea.vmem %s445_s29, 2048 }
  0x3f   : > { %p447_p8 = scmp.lt.s32.totalorder %s653_s17, %s445_s29  ;;  %p448_p10 = scmp.lt.s32.totalorder %s446_s30, %s440_s27 }
  0x40   : > { %p443_p13 = pneg %p442_p12 }
  0x41   : > { %p449_p0 = por %p448_p10, %p447_p8 }
  0x43   : > { %p450_p2 = pnand %p449_p0, %p443_p13 }
  0x45   : > { %v409_v9 = vpop.eup %408 }
  0x46   : > { %v207_v13 = vrot.slane %v409_v9, %v206_v4  ;;  %v211_v15 = vrot.slane %v409_v9, %v210_v5 }
  0x48   : > { %v214_v20 = vmul.f32 %v207_v13, %v195_v7  ;;  %v215_v21 = vmul.f32 %v211_v15, %v196_v8  ;;  %v216_v22 = vmul.f32 %v207_v13, %v197_v10  ;;  %v217_v23 = vmul.f32 %v211_v15, %v198_v11 }
  0x49   : > { %v218_v24 = vmul.f32 %v207_v13, %v199_v12  ;;  %v219_v25 = vmul.f32 %v211_v15, %v200_v17  ;;  %v220_v26 = vmul.f32 %v207_v13, %v201_v18  ;;  %v221_v27 = vmul.f32 %v211_v15, %v202_v19 }
  0x4a   : > { %v234_v28 = vadd.f32 %v227_v14, %v214_v20  ;;  %v235_v29 = vadd.f32 %v231_v16, %v215_v21  ;;  %v236_v30 = vadd.f32 %v227_v14, %v216_v22  ;;  %v237_v31 = vadd.f32 %v231_v16, %v217_v23 }
  0x4b   : > { %v238_v32 = vadd.f32 %v227_v14, %v218_v24  ;;  %v239_v33 = vadd.f32 %v231_v16, %v219_v25  ;;  %v240_v34 = vadd.f32 %v227_v14, %v220_v26  ;;  %v241_v35 = vadd.f32 %v231_v16, %v221_v27 }
  0x4c   : > { %242 = vst [vmem:[%s189_s23] sm:$0xff] %v234_v28  ;;  %243 = vst [vmem:[%s189_s23 + $0x8] sm:$0xff] %v235_v29 }
  0x4d   : > { %244 = vst [vmem:[%s189_s23 + $0x10] sm:$0xff] %v236_v30  ;;  %245 = vst [vmem:[%s189_s23 + $0x18] sm:$0xff] %v237_v31 }
  0x4e   : > { %246 = vst [vmem:[%s189_s23 + $0x20] sm:$0xff] %v238_v32  ;;  %247 = vst [vmem:[%s189_s23 + $0x28] sm:$0xff] %v239_v33 }
  0x4f   : > { %248 = vst [vmem:[%s189_s23 + $0x30] sm:$0xff] %v240_v34  ;;  %249 = vst [vmem:[%s189_s23 + $0x38] sm:$0xff] %v241_v35 }
  0x50   : > { %453 = shalt.err (!%p450_p2)
}
  0x51   : > { %s454_s9 = scalar_lea.hbm %s658_s16, 1024  ;;  %s458_s7 = scalar_lea.hbm %s705_s3, 2048 }
  0x52   : > { %p455_p4 = scmp.ne.s32.totalorder %s658_s16, %s454_s9  ;;  %p459_p9 = scmp.lt.u32.totalorder %s658_s16, %s705_s3 }
  0x53   : > { %p460_p1 = scmp.lt.u32.totalorder %s458_s7, %s454_s9  ;;  %p462_p6 = scmp.lt.u32.totalorder %s454_s9, %s658_s16 }
  0x54   : > { %p456_p5 = pnand %p455_p4, %p712_p11 }
  0x55   : > { %p461_p3 = por %p460_p1, %p459_p9 }
  0x56   : > { %p457_p7 = pneg %p456_p5 }
  0x57   : > { %p463_p12 = por %p462_p6, %p461_p3 }
  0x59   : > { %p464_p13 = pnand %p463_p12, %p457_p7 }
  0x5b   : > { %467 = shalt.err (!%p464_p13)
}
  0x5c   : > { %s512_s8 = smov 256   ;;  %s513_s23 = smov 16  }
  0x5d   : > { %360 = dma.vmem_to_hbm [thread:$0]  (%p712_p11), %s653_s17, 1024, %s658_s16, %s251_s26, %s512_s8, %s512_s8, %s513_s23  }
  0x5e PF: > { %s280_s19 = sand.u32 1, %s494_s12   ;;  %p713_p8 = scmp.ne.s32.totalorder %s710_s25, 0 }
  0x5f   : > { %p714_p10 = scmp.ge.s32.totalorder %s506_s15, 2  ;;  %s281_s20 = scalar_lea.sflag [#allocation4], %s280_s19 }
  0x61   : > { %p367_p0 = pnand %p714_p10, %p713_p8 }
  0x63   : > { %489 = dma.done.wait (!%p367_p0), %s281_s20, 1024  }
  0x64   : > { %491 = vsyncadd (!%p367_p0), %s281_s20, 4294966272  ;;  %p16_p2 = scmp.ge.s32.totalorder %s559_s18, 4   ;;  %s715_s12 = smov %s498_s13 }
  0x65   : > { %s716_s13 = smov %s502_s14  ;;  %s717_s14 = smov %s571_s21 }
  0x66   : > { %s718_s15 = smov %s559_s18  ;;  %18 = sbr.rel (!%p16_p2) target bundleno = 5 (0x5), region = 77 }
  0x6d   :  { %286 = vsyncpa [#allocation3], 1 }
  0x6e   :  { %288 = vsyncpa [#allocation3 + $0x1], 1 }
  0x6f   :  { %289 = vsyncpa [#allocation4], 1 }
  0x70   :  { %291 = vsyncpa [#allocation4 + $0x1], 1 }

</bundles_post_ra>
